<compile_context>
chip_gen: v6e
topology: v6e:2x2x1
jax: 0.10.0
libtpu: 0.0.40
codegen_flags: <defaults>
</compile_context>

<pallas_src>
import functools

import jax
import jax.numpy as jnp
from jax.experimental import pallas as pl
from jax.experimental.pallas import tpu as pltpu


def _round_up(x, m):
    return (x + m - 1) // m * m


# ----------------------------------------------------------------------------
# Fused kernel: direct conv (stacked-K shift-and-matmul) + BN(train) + ReLU.
#
#   x_ref     : (N, C_pad, LP)        bf16 flattened zero-padded input slabs
#   w_ref     : (OC_pad, KH*KW*C_pad) bf16 stacked weight (tap-major, then c)
#   mask_ref  : (KW, 1, OHW)          bf16 0/1 width-boundary masks
#   gamma_ref : (OC_pad, 1)           f32 BN gamma (padded)
#   beta_ref  : (OC_pad, 1)           f32 BN beta  (padded)
#   o_ref     : (N, OC_pad, OHW)      f32 output (OC on sublanes, OHW on lanes)
#   rhs_ref   : (KH*KW*C_pad, N*OHW)  bf16 VMEM scratch (stacked RHS)
# ----------------------------------------------------------------------------
def _conv_bn_relu_kernel(x_ref, w_ref, mask_ref, gamma_ref, beta_ref,
                         o_ref, rhs_ref, *,
                         N, W, KH, KW, PAD, OHW, C_PAD, EPS):
    # Build the stacked-K RHS in VMEM: one shifted (+ width-masked) copy of the
    # slab per (tap, image).  Store offsets are sublane/lane aligned
    # (multiples of 8 / 256); the width mask is fused into the copy.
    for nn in range(N):
        for i in range(KH):
            for j in range(KW):
                tap = i * KW + j
                s = i * W + j                          # static window offset
                win = x_ref[nn, :, s:s + OHW]          # (C_PAD, OHW) bf16
                if j != PAD:                           # center tap: no mask
                    win = win * mask_ref[j]            # (1, OHW) broadcast
                rhs_ref[tap * C_PAD:(tap + 1) * C_PAD,
                        nn * OHW:(nn + 1) * OHW] = win

    # One MXU matmul, bf16 operands, f32 accumulation.
    acc = jnp.dot(w_ref[...], rhs_ref[...],
                  preferred_element_type=jnp.float32)  # (OC_PAD, N*OHW) f32

    # Training-mode BatchNorm statistics over the whole batch (lane axis).
    inv_m = 1.0 / float(N * OHW)
    mean = jnp.sum(acc, axis=1, keepdims=True) * inv_m              # (OC_PAD,1)
    var = jnp.maximum(
        jnp.sum(acc * acc, axis=1, keepdims=True) * inv_m - mean * mean, 0.0)
    scale = gamma_ref[...] * jax.lax.rsqrt(var + EPS)
    shift = beta_ref[...] - mean * scale

    # BN affine + ReLU while acc is still resident in f32.
    y = jnp.maximum(acc * scale + shift, 0.0)          # (OC_PAD, N*OHW)

    # Lane-aligned per-image writeback (lane offsets are multiples of 256).
    for nn in range(N):
        o_ref[nn] = y[:, nn * OHW:(nn + 1) * OHW].astype(o_ref.dtype)


# ----------------------------------------------------------------------------
# Wrapper: Conv2d -> BatchNorm2d (training-mode batch stats) -> ReLU
# ----------------------------------------------------------------------------
@functools.partial(jax.jit, static_argnames=("stride", "padding", "eps"))
def conv_bn_relu(x, weight, bias, gamma, beta, *, stride, padding, eps=1e-5):
    # Conv bias is accepted for API parity but dropped: it cancels exactly
    # under training-mode BatchNorm (mean shifts by bias, variance unchanged).
    del bias

    n, c, h, w_dim = x.shape
    oc, _, kh, kw = weight.shape
    oh = (h + 2 * padding - kh) // stride + 1
    ow = (w_dim + 2 * padding - kw) // stride + 1

    # TODO(synk): stride > 1 or non-'same' width padding needs a strided
    # interior extraction; only the stride-1, 2*padding == kw-1 case is lowered.
    if stride != 1 or ow != w_dim:
        raise NotImplementedError(
            "Pallas fast path requires stride == 1 and 2*padding == kw - 1")

    c_pad = _round_up(c, 8)
    oc_pad = _round_up(oc, 8)
    ohw = oh * ow
    ktot = kh * kw * c_pad

    # Flattened per-channel slab: [front zeros | H*W image | back zeros].
    front = padding * w_dim + padding
    back = padding * w_dim + max(kw - 1 - padding, 0)
    lp = h * w_dim + front + back

    # bf16 MXU operands (f32 accumulation inside the kernel).
    x_slab = jnp.pad(x.astype(jnp.bfloat16).reshape(n, c, h * w_dim),
                     ((0, 0), (0, c_pad - c), (front, back)))

    # Stacked weight: w_stk[oc, tap*C_pad + c] = weight[oc, c, i, j], tap=i*kw+j
    w_stk = jnp.transpose(weight, (0, 2, 3, 1)).reshape(oc, kh * kw, c)
    w_stk = jnp.pad(w_stk, ((0, oc_pad - oc), (0, 0), (0, c_pad - c)))
    w_stk = w_stk.reshape(oc_pad, ktot).astype(jnp.bfloat16)

    # Width-boundary masks: kill reads that would wrap to the adjacent row.
    col = jnp.arange(ohw, dtype=jnp.int32) % w_dim
    masks = jnp.stack(
        [((col >= (padding - j)) & (col < (w_dim + padding - j)))
         .astype(jnp.bfloat16) for j in range(kw)], axis=0)
    masks = masks.reshape(kw, 1, ohw)

    gamma_p = jnp.pad(gamma.astype(jnp.float32),
                      (0, oc_pad - oc)).reshape(oc_pad, 1)
    beta_p = jnp.pad(beta.astype(jnp.float32),
                     (0, oc_pad - oc)).reshape(oc_pad, 1)

    kernel = functools.partial(_conv_bn_relu_kernel, N=n, W=w_dim, KH=kh,
                               KW=kw, PAD=padding, OHW=ohw, C_PAD=c_pad,
                               EPS=float(eps))

    cost = pl.CostEstimate(
        flops=2 * n * oc * c * kh * kw * oh * ow + 6 * n * oc_pad * ohw,
        transcendentals=oc_pad,
        bytes_accessed=(2 * (x_slab.size + w_stk.size + masks.size)
                        + 4 * (gamma_p.size + beta_p.size + n * oc_pad * ohw)))

    y = pl.pallas_call(
        kernel,
        out_shape=jax.ShapeDtypeStruct((n, oc_pad, ohw), jnp.float32),
        grid=(1,),
        in_specs=[
            pl.BlockSpec((n, c_pad, lp), lambda i: (0, 0, 0)),
            pl.BlockSpec((oc_pad, ktot), lambda i: (0, 0)),
            pl.BlockSpec((kw, 1, ohw), lambda i: (0, 0, 0)),
            pl.BlockSpec((oc_pad, 1), lambda i: (0, 0)),
            pl.BlockSpec((oc_pad, 1), lambda i: (0, 0)),
        ],
        out_specs=pl.BlockSpec((n, oc_pad, ohw), lambda i: (0, 0, 0)),
        scratch_shapes=[pltpu.VMEM((ktot, n * ohw), jnp.bfloat16)],
        compiler_params=pltpu.CompilerParams(
            dimension_semantics=("arbitrary",),
            # Explicit, generous-but-safe budget (usage here is < 1 MiB).
            vmem_limit_bytes=32 * 1024 * 1024),
        cost_estimate=cost,
    )(x_slab, w_stk, masks, gamma_p, beta_p)

    # (N, OC_pad, OH*OW) -> (N, OC, OH, OW): channel slice + free reshape.
    return y[:, :oc, :].reshape(n, oc, oh, ow)


# ----------------------------------------------------------------------------
# Pure-JAX reference (mirrors PyTorch Conv -> BN(train) -> ReLU, incl. bias)
# ----------------------------------------------------------------------------
def _reference(x, weight, bias, gamma, beta, *, stride, padding, eps=1e-5):
    y = jax.lax.conv_general_dilated(
        x, weight, window_strides=(stride, stride),
        padding=[(padding, padding), (padding, padding)],
        dimension_numbers=("NCHW", "OIHW", "NCHW"))
    y = y + bias.reshape(1, -1, 1, 1)
    mean = jnp.mean(y, axis=(0, 2, 3), keepdims=True)
    var = jnp.mean((y - mean) ** 2, axis=(0, 2, 3), keepdims=True)
    y = (y - mean) * jax.lax.rsqrt(var + eps)
    y = y * gamma.reshape(1, -1, 1, 1) + beta.reshape(1, -1, 1, 1)
    return jnp.maximum(y, 0.0)


if __name__ == "__main__":
    # Module config: Conv(input_channel=4, output_channel=8, kernel_size=3,
    #                     stride=1, padding=1)
    N, C_IN, H, W = 2, 4, 16, 16
    C_OUT, KSIZE, STRIDE, PAD = 8, 3, 1, 1

    key = jax.random.PRNGKey(0)
    kx, kw_, kb, kg, kbt = jax.random.split(key, 5)

    x = jax.random.normal(kx, (N, C_IN, H, W), dtype=jnp.float32)
    fan_in = C_IN * KSIZE * KSIZE
    weight = jax.random.normal(kw_, (C_OUT, C_IN, KSIZE, KSIZE),
                               dtype=jnp.float32) / jnp.sqrt(fan_in)
    bias = jax.random.normal(kb, (C_OUT,), dtype=jnp.float32) * 0.1
    gamma = 1.0 + 0.1 * jax.random.normal(kg, (C_OUT,), dtype=jnp.float32)
    beta = 0.1 * jax.random.normal(kbt, (C_OUT,), dtype=jnp.float32)

    out = conv_bn_relu(x, weight, bias, gamma, beta,
                       stride=STRIDE, padding=PAD)
    out = jax.block_until_ready(out)
    assert out.shape == (N, C_OUT, H, W)

    # Tight check vs. a reference fed the same bf16-rounded conv operands
    # (isolates algorithmic error from MXU-operand quantization).
    ref_match = _reference(x.astype(jnp.bfloat16).astype(jnp.float32),
                           weight.astype(jnp.bfloat16).astype(jnp.float32),
                           bias, gamma, beta, stride=STRIDE, padding=PAD)
    err_match = float(jnp.max(jnp.abs(out - ref_match)))
    assert jnp.allclose(out, ref_match, atol=2e-3, rtol=1e-3), (
        "max abs err (bf16-matched ref) = %s" % err_match)

    # Loose sanity check vs. the pure-f32 reference (bounds bf16 rounding).
    ref_f32 = _reference(x, weight, bias, gamma, beta,
                         stride=STRIDE, padding=PAD)
    err_f32 = float(jnp.max(jnp.abs(out - ref_f32)))
    assert jnp.allclose(out, ref_f32, atol=5e-2, rtol=5e-2), (
        "max abs err (f32 ref) = %s" % err_f32)

    print("KERNEL_OK")
</pallas_src>

<mosaic_0001>
module attributes {stable_mosaic.version = 11 : i64} {
  func.func @_conv_bn_relu_kernel(%arg0: i32, %arg1: memref<2x8x290xbf16, #tpu.memory_space<vmem>>, %arg2: memref<8x72xbf16, #tpu.memory_space<vmem>>, %arg3: memref<3x1x256xbf16, #tpu.memory_space<vmem>>, %arg4: memref<8x1xf32, #tpu.memory_space<vmem>>, %arg5: memref<8x1xf32, #tpu.memory_space<vmem>>, %arg6: memref<2x8x256xf32, #tpu.memory_space<vmem>>, %arg7: memref<72x512xbf16, #tpu.memory_space<vmem>>) attributes {dimension_semantics = [#tpu.dimension_semantics<arbitrary>], iteration_bounds = array<i64: 1>, scalar_prefetch = 0 : i64, scratch_operands = 1 : i64, tpu.core_type = #tpu.core_type<tc>, window_params = [{pipeline_mode = #tpu.pipeline_mode<synchronous>, transform_indices = @transform_0, window_bounds = array<i64: 2, 8, 290>}, {pipeline_mode = #tpu.pipeline_mode<synchronous>, transform_indices = @transform_1, window_bounds = array<i64: 8, 72>}, {pipeline_mode = #tpu.pipeline_mode<synchronous>, transform_indices = @transform_2, window_bounds = array<i64: 3, 1, 256>}, {pipeline_mode = #tpu.pipeline_mode<synchronous>, transform_indices = @transform_3, window_bounds = array<i64: 8, 1>}, {pipeline_mode = #tpu.pipeline_mode<synchronous>, transform_indices = @transform_4, window_bounds = array<i64: 8, 1>}, {pipeline_mode = #tpu.pipeline_mode<synchronous>, transform_indices = @transform_5, window_bounds = array<i64: 2, 8, 256>}]} {
    %c0 = arith.constant 0 : index
    %c0_0 = arith.constant 0 : index
    %c0_1 = arith.constant 0 : index
    %0 = vector.load %arg1[%c0, %c0_0, %c0_1] : memref<2x8x290xbf16, #tpu.memory_space<vmem>>, vector<1x8x256xbf16>
    %1 = vector.shape_cast %0 : vector<1x8x256xbf16> to vector<8x256xbf16>
    %c0_2 = arith.constant 0 : index
    %c0_3 = arith.constant 0 : index
    %c0_4 = arith.constant 0 : index
    %2 = vector.load %arg3[%c0_2, %c0_3, %c0_4] : memref<3x1x256xbf16, #tpu.memory_space<vmem>>, vector<1x1x256xbf16>
    %3 = vector.shape_cast %2 : vector<1x1x256xbf16> to vector<1x256xbf16>
    %4 = vector.broadcast %3 : vector<1x256xbf16> to vector<8x256xbf16>
    %5 = arith.mulf %1, %4 : vector<8x256xbf16>
    %c0_5 = arith.constant 0 : index
    %c0_6 = arith.constant 0 : index
    %6 = vector.load %arg7[%c0_5, %c0_6] : memref<72x512xbf16, #tpu.memory_space<vmem>>, vector<8x256xbf16>
    tpu.vector_store %arg7[%c0_5, %c0_6], %5 {strides = array<i32>} : memref<72x512xbf16, #tpu.memory_space<vmem>>, vector<8x256xbf16>,
    %c0_7 = arith.constant 0 : index
    %c0_8 = arith.constant 0 : index
    %c1 = arith.constant 1 : index
    %7 = vector.load %arg1[%c0_7, %c0_8, %c1] : memref<2x8x290xbf16, #tpu.memory_space<vmem>>, vector<1x8x256xbf16>
    %8 = vector.shape_cast %7 : vector<1x8x256xbf16> to vector<8x256xbf16>
    %c8 = arith.constant 8 : index
    %c0_9 = arith.constant 0 : index
    %9 = vector.load %arg7[%c8, %c0_9] : memref<72x512xbf16, #tpu.memory_space<vmem>>, vector<8x256xbf16>
    tpu.vector_store %arg7[%c8, %c0_9], %8 {strides = array<i32>} : memref<72x512xbf16, #tpu.memory_space<vmem>>, vector<8x256xbf16>,
    %c0_10 = arith.constant 0 : index
    %c0_11 = arith.constant 0 : index
    %c2 = arith.constant 2 : index
    %10 = vector.load %arg1[%c0_10, %c0_11, %c2] : memref<2x8x290xbf16, #tpu.memory_space<vmem>>, vector<1x8x256xbf16>
    %11 = vector.shape_cast %10 : vector<1x8x256xbf16> to vector<8x256xbf16>
    %c2_12 = arith.constant 2 : index
    %c0_13 = arith.constant 0 : index
    %c0_14 = arith.constant 0 : index
    %12 = vector.load %arg3[%c2_12, %c0_13, %c0_14] : memref<3x1x256xbf16, #tpu.memory_space<vmem>>, vector<1x1x256xbf16>
    %13 = vector.shape_cast %12 : vector<1x1x256xbf16> to vector<1x256xbf16>
    %14 = vector.broadcast %13 : vector<1x256xbf16> to vector<8x256xbf16>
    %15 = arith.mulf %11, %14 : vector<8x256xbf16>
    %c16 = arith.constant 16 : index
    %c0_15 = arith.constant 0 : index
    %16 = vector.load %arg7[%c16, %c0_15] : memref<72x512xbf16, #tpu.memory_space<vmem>>, vector<8x256xbf16>
    tpu.vector_store %arg7[%c16, %c0_15], %15 {strides = array<i32>} : memref<72x512xbf16, #tpu.memory_space<vmem>>, vector<8x256xbf16>,
    %c0_16 = arith.constant 0 : index
    %c0_17 = arith.constant 0 : index
    %c16_18 = arith.constant 16 : index
    %17 = vector.load %arg1[%c0_16, %c0_17, %c16_18] : memref<2x8x290xbf16, #tpu.memory_space<vmem>>, vector<1x8x256xbf16>
    %18 = vector.shape_cast %17 : vector<1x8x256xbf16> to vector<8x256xbf16>
    %c0_19 = arith.constant 0 : index
    %c0_20 = arith.constant 0 : index
    %c0_21 = arith.constant 0 : index
    %19 = vector.load %arg3[%c0_19, %c0_20, %c0_21] : memref<3x1x256xbf16, #tpu.memory_space<vmem>>, vector<1x1x256xbf16>
    %20 = vector.shape_cast %19 : vector<1x1x256xbf16> to vector<1x256xbf16>
    %21 = vector.broadcast %20 : vector<1x256xbf16> to vector<8x256xbf16>
    %22 = arith.mulf %18, %21 : vector<8x256xbf16>
    %c24 = arith.constant 24 : index
    %c0_22 = arith.constant 0 : index
    %23 = vector.load %arg7[%c24, %c0_22] : memref<72x512xbf16, #tpu.memory_space<vmem>>, vector<8x256xbf16>
    tpu.vector_store %arg7[%c24, %c0_22], %22 {strides = array<i32>} : memref<72x512xbf16, #tpu.memory_space<vmem>>, vector<8x256xbf16>,
    %c0_23 = arith.constant 0 : index
    %c0_24 = arith.constant 0 : index
    %c17 = arith.constant 17 : index
    %24 = vector.load %arg1[%c0_23, %c0_24, %c17] : memref<2x8x290xbf16, #tpu.memory_space<vmem>>, vector<1x8x256xbf16>
    %25 = vector.shape_cast %24 : vector<1x8x256xbf16> to vector<8x256xbf16>
    %c32 = arith.constant 32 : index
    %c0_25 = arith.constant 0 : index
    %26 = vector.load %arg7[%c32, %c0_25] : memref<72x512xbf16, #tpu.memory_space<vmem>>, vector<8x256xbf16>
    tpu.vector_store %arg7[%c32, %c0_25], %25 {strides = array<i32>} : memref<72x512xbf16, #tpu.memory_space<vmem>>, vector<8x256xbf16>,
    %c0_26 = arith.constant 0 : index
    %c0_27 = arith.constant 0 : index
    %c18 = arith.constant 18 : index
    %27 = vector.load %arg1[%c0_26, %c0_27, %c18] : memref<2x8x290xbf16, #tpu.memory_space<vmem>>, vector<1x8x256xbf16>
    %28 = vector.shape_cast %27 : vector<1x8x256xbf16> to vector<8x256xbf16>
    %c2_28 = arith.constant 2 : index
    %c0_29 = arith.constant 0 : index
    %c0_30 = arith.constant 0 : index
    %29 = vector.load %arg3[%c2_28, %c0_29, %c0_30] : memref<3x1x256xbf16, #tpu.memory_space<vmem>>, vector<1x1x256xbf16>
    %30 = vector.shape_cast %29 : vector<1x1x256xbf16> to vector<1x256xbf16>
    %31 = vector.broadcast %30 : vector<1x256xbf16> to vector<8x256xbf16>
    %32 = arith.mulf %28, %31 : vector<8x256xbf16>
    %c40 = arith.constant 40 : index
    %c0_31 = arith.constant 0 : index
    %33 = vector.load %arg7[%c40, %c0_31] : memref<72x512xbf16, #tpu.memory_space<vmem>>, vector<8x256xbf16>
    tpu.vector_store %arg7[%c40, %c0_31], %32 {strides = array<i32>} : memref<72x512xbf16, #tpu.memory_space<vmem>>, vector<8x256xbf16>,
    %c0_32 = arith.constant 0 : index
    %c0_33 = arith.constant 0 : index
    %c32_34 = arith.constant 32 : index
    %34 = vector.load %arg1[%c0_32, %c0_33, %c32_34] : memref<2x8x290xbf16, #tpu.memory_space<vmem>>, vector<1x8x256xbf16>
    %35 = vector.shape_cast %34 : vector<1x8x256xbf16> to vector<8x256xbf16>
    %c0_35 = arith.constant 0 : index
    %c0_36 = arith.constant 0 : index
    %c0_37 = arith.constant 0 : index
    %36 = vector.load %arg3[%c0_35, %c0_36, %c0_37] : memref<3x1x256xbf16, #tpu.memory_space<vmem>>, vector<1x1x256xbf16>
    %37 = vector.shape_cast %36 : vector<1x1x256xbf16> to vector<1x256xbf16>
    %38 = vector.broadcast %37 : vector<1x256xbf16> to vector<8x256xbf16>
    %39 = arith.mulf %35, %38 : vector<8x256xbf16>
    %c48 = arith.constant 48 : index
    %c0_38 = arith.constant 0 : index
    %40 = vector.load %arg7[%c48, %c0_38] : memref<72x512xbf16, #tpu.memory_space<vmem>>, vector<8x256xbf16>
    tpu.vector_store %arg7[%c48, %c0_38], %39 {strides = array<i32>} : memref<72x512xbf16, #tpu.memory_space<vmem>>, vector<8x256xbf16>,
    %c0_39 = arith.constant 0 : index
    %c0_40 = arith.constant 0 : index
    %c33 = arith.constant 33 : index
    %41 = vector.load %arg1[%c0_39, %c0_40, %c33] : memref<2x8x290xbf16, #tpu.memory_space<vmem>>, vector<1x8x256xbf16>
    %42 = vector.shape_cast %41 : vector<1x8x256xbf16> to vector<8x256xbf16>
    %c56 = arith.constant 56 : index
    %c0_41 = arith.constant 0 : index
    %43 = vector.load %arg7[%c56, %c0_41] : memref<72x512xbf16, #tpu.memory_space<vmem>>, vector<8x256xbf16>
    tpu.vector_store %arg7[%c56, %c0_41], %42 {strides = array<i32>} : memref<72x512xbf16, #tpu.memory_space<vmem>>, vector<8x256xbf16>,
    %c0_42 = arith.constant 0 : index
    %c0_43 = arith.constant 0 : index
    %c34 = arith.constant 34 : index
    %44 = vector.load %arg1[%c0_42, %c0_43, %c34] : memref<2x8x290xbf16, #tpu.memory_space<vmem>>, vector<1x8x256xbf16>
    %45 = vector.shape_cast %44 : vector<1x8x256xbf16> to vector<8x256xbf16>
    %c2_44 = arith.constant 2 : index
    %c0_45 = arith.constant 0 : index
    %c0_46 = arith.constant 0 : index
    %46 = vector.load %arg3[%c2_44, %c0_45, %c0_46] : memref<3x1x256xbf16, #tpu.memory_space<vmem>>, vector<1x1x256xbf16>
    %47 = vector.shape_cast %46 : vector<1x1x256xbf16> to vector<1x256xbf16>
    %48 = vector.broadcast %47 : vector<1x256xbf16> to vector<8x256xbf16>
    %49 = arith.mulf %45, %48 : vector<8x256xbf16>
    %c64 = arith.constant 64 : index
    %c0_47 = arith.constant 0 : index
    %50 = vector.load %arg7[%c64, %c0_47] : memref<72x512xbf16, #tpu.memory_space<vmem>>, vector<8x256xbf16>
    tpu.vector_store %arg7[%c64, %c0_47], %49 {strides = array<i32>} : memref<72x512xbf16, #tpu.memory_space<vmem>>, vector<8x256xbf16>,
    %c1_48 = arith.constant 1 : index
    %c0_49 = arith.constant 0 : index
    %c0_50 = arith.constant 0 : index
    %51 = vector.load %arg1[%c1_48, %c0_49, %c0_50] : memref<2x8x290xbf16, #tpu.memory_space<vmem>>, vector<1x8x256xbf16>
    %52 = vector.shape_cast %51 : vector<1x8x256xbf16> to vector<8x256xbf16>
    %c0_51 = arith.constant 0 : index
    %c0_52 = arith.constant 0 : index
    %c0_53 = arith.constant 0 : index
    %53 = vector.load %arg3[%c0_51, %c0_52, %c0_53] : memref<3x1x256xbf16, #tpu.memory_space<vmem>>, vector<1x1x256xbf16>
    %54 = vector.shape_cast %53 : vector<1x1x256xbf16> to vector<1x256xbf16>
    %55 = vector.broadcast %54 : vector<1x256xbf16> to vector<8x256xbf16>
    %56 = arith.mulf %52, %55 : vector<8x256xbf16>
    %c0_54 = arith.constant 0 : index
    %c256 = arith.constant 256 : index
    %57 = vector.load %arg7[%c0_54, %c256] : memref<72x512xbf16, #tpu.memory_space<vmem>>, vector<8x256xbf16>
    tpu.vector_store %arg7[%c0_54, %c256], %56 {strides = array<i32>} : memref<72x512xbf16, #tpu.memory_space<vmem>>, vector<8x256xbf16>,
    %c1_55 = arith.constant 1 : index
    %c0_56 = arith.constant 0 : index
    %c1_57 = arith.constant 1 : index
    %58 = vector.load %arg1[%c1_55, %c0_56, %c1_57] : memref<2x8x290xbf16, #tpu.memory_space<vmem>>, vector<1x8x256xbf16>
    %59 = vector.shape_cast %58 : vector<1x8x256xbf16> to vector<8x256xbf16>
    %c8_58 = arith.constant 8 : index
    %c256_59 = arith.constant 256 : index
    %60 = vector.load %arg7[%c8_58, %c256_59] : memref<72x512xbf16, #tpu.memory_space<vmem>>, vector<8x256xbf16>
    tpu.vector_store %arg7[%c8_58, %c256_59], %59 {strides = array<i32>} : memref<72x512xbf16, #tpu.memory_space<vmem>>, vector<8x256xbf16>,
    %c1_60 = arith.constant 1 : index
    %c0_61 = arith.constant 0 : index
    %c2_62 = arith.constant 2 : index
    %61 = vector.load %arg1[%c1_60, %c0_61, %c2_62] : memref<2x8x290xbf16, #tpu.memory_space<vmem>>, vector<1x8x256xbf16>
    %62 = vector.shape_cast %61 : vector<1x8x256xbf16> to vector<8x256xbf16>
    %c2_63 = arith.constant 2 : index
    %c0_64 = arith.constant 0 : index
    %c0_65 = arith.constant 0 : index
    %63 = vector.load %arg3[%c2_63, %c0_64, %c0_65] : memref<3x1x256xbf16, #tpu.memory_space<vmem>>, vector<1x1x256xbf16>
    %64 = vector.shape_cast %63 : vector<1x1x256xbf16> to vector<1x256xbf16>
    %65 = vector.broadcast %64 : vector<1x256xbf16> to vector<8x256xbf16>
    %66 = arith.mulf %62, %65 : vector<8x256xbf16>
    %c16_66 = arith.constant 16 : index
    %c256_67 = arith.constant 256 : index
    %67 = vector.load %arg7[%c16_66, %c256_67] : memref<72x512xbf16, #tpu.memory_space<vmem>>, vector<8x256xbf16>
    tpu.vector_store %arg7[%c16_66, %c256_67], %66 {strides = array<i32>} : memref<72x512xbf16, #tpu.memory_space<vmem>>, vector<8x256xbf16>,
    %c1_68 = arith.constant 1 : index
    %c0_69 = arith.constant 0 : index
    %c16_70 = arith.constant 16 : index
    %68 = vector.load %arg1[%c1_68, %c0_69, %c16_70] : memref<2x8x290xbf16, #tpu.memory_space<vmem>>, vector<1x8x256xbf16>
    %69 = vector.shape_cast %68 : vector<1x8x256xbf16> to vector<8x256xbf16>
    %c0_71 = arith.constant 0 : index
    %c0_72 = arith.constant 0 : index
    %c0_73 = arith.constant 0 : index
    %70 = vector.load %arg3[%c0_71, %c0_72, %c0_73] : memref<3x1x256xbf16, #tpu.memory_space<vmem>>, vector<1x1x256xbf16>
    %71 = vector.shape_cast %70 : vector<1x1x256xbf16> to vector<1x256xbf16>
    %72 = vector.broadcast %71 : vector<1x256xbf16> to vector<8x256xbf16>
    %73 = arith.mulf %69, %72 : vector<8x256xbf16>
    %c24_74 = arith.constant 24 : index
    %c256_75 = arith.constant 256 : index
    %74 = vector.load %arg7[%c24_74, %c256_75] : memref<72x512xbf16, #tpu.memory_space<vmem>>, vector<8x256xbf16>
    tpu.vector_store %arg7[%c24_74, %c256_75], %73 {strides = array<i32>} : memref<72x512xbf16, #tpu.memory_space<vmem>>, vector<8x256xbf16>,
    %c1_76 = arith.constant 1 : index
    %c0_77 = arith.constant 0 : index
    %c17_78 = arith.constant 17 : index
    %75 = vector.load %arg1[%c1_76, %c0_77, %c17_78] : memref<2x8x290xbf16, #tpu.memory_space<vmem>>, vector<1x8x256xbf16>
    %76 = vector.shape_cast %75 : vector<1x8x256xbf16> to vector<8x256xbf16>
    %c32_79 = arith.constant 32 : index
    %c256_80 = arith.constant 256 : index
    %77 = vector.load %arg7[%c32_79, %c256_80] : memref<72x512xbf16, #tpu.memory_space<vmem>>, vector<8x256xbf16>
    tpu.vector_store %arg7[%c32_79, %c256_80], %76 {strides = array<i32>} : memref<72x512xbf16, #tpu.memory_space<vmem>>, vector<8x256xbf16>,
    %c1_81 = arith.constant 1 : index
    %c0_82 = arith.constant 0 : index
    %c18_83 = arith.constant 18 : index
    %78 = vector.load %arg1[%c1_81, %c0_82, %c18_83] : memref<2x8x290xbf16, #tpu.memory_space<vmem>>, vector<1x8x256xbf16>
    %79 = vector.shape_cast %78 : vector<1x8x256xbf16> to vector<8x256xbf16>
    %c2_84 = arith.constant 2 : index
    %c0_85 = arith.constant 0 : index
    %c0_86 = arith.constant 0 : index
    %80 = vector.load %arg3[%c2_84, %c0_85, %c0_86] : memref<3x1x256xbf16, #tpu.memory_space<vmem>>, vector<1x1x256xbf16>
    %81 = vector.shape_cast %80 : vector<1x1x256xbf16> to vector<1x256xbf16>
    %82 = vector.broadcast %81 : vector<1x256xbf16> to vector<8x256xbf16>
    %83 = arith.mulf %79, %82 : vector<8x256xbf16>
    %c40_87 = arith.constant 40 : index
    %c256_88 = arith.constant 256 : index
    %84 = vector.load %arg7[%c40_87, %c256_88] : memref<72x512xbf16, #tpu.memory_space<vmem>>, vector<8x256xbf16>
    tpu.vector_store %arg7[%c40_87, %c256_88], %83 {strides = array<i32>} : memref<72x512xbf16, #tpu.memory_space<vmem>>, vector<8x256xbf16>,
    %c1_89 = arith.constant 1 : index
    %c0_90 = arith.constant 0 : index
    %c32_91 = arith.constant 32 : index
    %85 = vector.load %arg1[%c1_89, %c0_90, %c32_91] : memref<2x8x290xbf16, #tpu.memory_space<vmem>>, vector<1x8x256xbf16>
    %86 = vector.shape_cast %85 : vector<1x8x256xbf16> to vector<8x256xbf16>
    %c0_92 = arith.constant 0 : index
    %c0_93 = arith.constant 0 : index
    %c0_94 = arith.constant 0 : index
    %87 = vector.load %arg3[%c0_92, %c0_93, %c0_94] : memref<3x1x256xbf16, #tpu.memory_space<vmem>>, vector<1x1x256xbf16>
    %88 = vector.shape_cast %87 : vector<1x1x256xbf16> to vector<1x256xbf16>
    %89 = vector.broadcast %88 : vector<1x256xbf16> to vector<8x256xbf16>
    %90 = arith.mulf %86, %89 : vector<8x256xbf16>
    %c48_95 = arith.constant 48 : index
    %c256_96 = arith.constant 256 : index
    %91 = vector.load %arg7[%c48_95, %c256_96] : memref<72x512xbf16, #tpu.memory_space<vmem>>, vector<8x256xbf16>
    tpu.vector_store %arg7[%c48_95, %c256_96], %90 {strides = array<i32>} : memref<72x512xbf16, #tpu.memory_space<vmem>>, vector<8x256xbf16>,
    %c1_97 = arith.constant 1 : index
    %c0_98 = arith.constant 0 : index
    %c33_99 = arith.constant 33 : index
    %92 = vector.load %arg1[%c1_97, %c0_98, %c33_99] : memref<2x8x290xbf16, #tpu.memory_space<vmem>>, vector<1x8x256xbf16>
    %93 = vector.shape_cast %92 : vector<1x8x256xbf16> to vector<8x256xbf16>
    %c56_100 = arith.constant 56 : index
    %c256_101 = arith.constant 256 : index
    %94 = vector.load %arg7[%c56_100, %c256_101] : memref<72x512xbf16, #tpu.memory_space<vmem>>, vector<8x256xbf16>
    tpu.vector_store %arg7[%c56_100, %c256_101], %93 {strides = array<i32>} : memref<72x512xbf16, #tpu.memory_space<vmem>>, vector<8x256xbf16>,
    %c1_102 = arith.constant 1 : index
    %c0_103 = arith.constant 0 : index
    %c34_104 = arith.constant 34 : index
    %95 = vector.load %arg1[%c1_102, %c0_103, %c34_104] : memref<2x8x290xbf16, #tpu.memory_space<vmem>>, vector<1x8x256xbf16>
    %96 = vector.shape_cast %95 : vector<1x8x256xbf16> to vector<8x256xbf16>
    %c2_105 = arith.constant 2 : index
    %c0_106 = arith.constant 0 : index
    %c0_107 = arith.constant 0 : index
    %97 = vector.load %arg3[%c2_105, %c0_106, %c0_107] : memref<3x1x256xbf16, #tpu.memory_space<vmem>>, vector<1x1x256xbf16>
    %98 = vector.shape_cast %97 : vector<1x1x256xbf16> to vector<1x256xbf16>
    %99 = vector.broadcast %98 : vector<1x256xbf16> to vector<8x256xbf16>
    %100 = arith.mulf %96, %99 : vector<8x256xbf16>
    %c64_108 = arith.constant 64 : index
    %c256_109 = arith.constant 256 : index
    %101 = vector.load %arg7[%c64_108, %c256_109] : memref<72x512xbf16, #tpu.memory_space<vmem>>, vector<8x256xbf16>
    tpu.vector_store %arg7[%c64_108, %c256_109], %100 {strides = array<i32>} : memref<72x512xbf16, #tpu.memory_space<vmem>>, vector<8x256xbf16>,
    %c0_110 = arith.constant 0 : index
    %c0_111 = arith.constant 0 : index
    %102 = vector.load %arg2[%c0_110, %c0_111] : memref<8x72xbf16, #tpu.memory_space<vmem>>, vector<8x72xbf16>
    %c0_112 = arith.constant 0 : index
    %c0_113 = arith.constant 0 : index
    %103 = vector.load %arg7[%c0_112, %c0_113] : memref<72x512xbf16, #tpu.memory_space<vmem>>, vector<72x512xbf16>
    %cst = arith.constant dense<0.000000e+00> : vector<8x512xf32>
    %104 = tpu.matmul %102, %103, %cst {dimension_numbers = #tpu.dot_dimension_numbers<[1], [0], [0], [1], [0, 0, 1, 1], [], []>} : vector<8x72xbf16>, vector<72x512xbf16>, vector<8x512xf32> -> vector<8x512xf32>
    %cst_114 = arith.constant dense<0.000000e+00> : vector<8xf32>
    %105 = vector.multi_reduction <add>, %104, %cst_114 [1] : vector<8x512xf32> to vector<8xf32>
    %106 = vector.shape_cast %105 : vector<8xf32> to vector<8x1xf32>
    %cst_115 = arith.constant 0.001953125 : f32
    %107 = vector.broadcast %cst_115 : f32 to vector<8x1xf32>
    %108 = arith.mulf %106, %107 : vector<8x1xf32>
    %109 = arith.mulf %104, %104 : vector<8x512xf32>
    %cst_116 = arith.constant dense<0.000000e+00> : vector<8xf32>
    %110 = vector.multi_reduction <add>, %109, %cst_116 [1] : vector<8x512xf32> to vector<8xf32>
    %111 = vector.shape_cast %110 : vector<8xf32> to vector<8x1xf32>
    %cst_117 = arith.constant 0.001953125 : f32
    %112 = vector.broadcast %cst_117 : f32 to vector<8x1xf32>
    %113 = arith.mulf %111, %112 : vector<8x1xf32>
    %114 = arith.mulf %108, %108 : vector<8x1xf32>
    %115 = arith.subf %113, %114 : vector<8x1xf32>
    %cst_118 = arith.constant 0.000000e+00 : f32
    %116 = vector.broadcast %cst_118 : f32 to vector<8x1xf32>
    %117 = arith.maximumf %115, %116 : vector<8x1xf32>
    %c0_119 = arith.constant 0 : index
    %c0_120 = arith.constant 0 : index
    %118 = vector.load %arg4[%c0_119, %c0_120] : memref<8x1xf32, #tpu.memory_space<vmem>>, vector<8x1xf32>
    %cst_121 = arith.constant 9.99999974E-6 : f32
    %119 = vector.broadcast %cst_121 : f32 to vector<8x1xf32>
    %120 = arith.addf %117, %119 : vector<8x1xf32>
    %121 = math.rsqrt %120 : vector<8x1xf32>
    %122 = arith.mulf %118, %121 : vector<8x1xf32>
    %c0_122 = arith.constant 0 : index
    %c0_123 = arith.constant 0 : index
    %123 = vector.load %arg5[%c0_122, %c0_123] : memref<8x1xf32, #tpu.memory_space<vmem>>, vector<8x1xf32>
    %124 = arith.mulf %108, %122 : vector<8x1xf32>
    %125 = arith.subf %123, %124 : vector<8x1xf32>
    %126 = vector.broadcast %122 : vector<8x1xf32> to vector<8x512xf32>
    %127 = arith.mulf %104, %126 : vector<8x512xf32>
    %128 = vector.broadcast %125 : vector<8x1xf32> to vector<8x512xf32>
    %129 = arith.addf %127, %128 : vector<8x512xf32>
    %cst_124 = arith.constant 0.000000e+00 : f32
    %130 = vector.broadcast %cst_124 : f32 to vector<8x512xf32>
    %131 = arith.maximumf %129, %130 : vector<8x512xf32>
    %132 = vector.extract_strided_slice %131 {offsets = [0, 0], sizes = [8, 256], strides = [1, 1]} : vector<8x512xf32> to vector<8x256xf32>
    %c0_125 = arith.constant 0 : index
    %c0_126 = arith.constant 0 : index
    %c0_127 = arith.constant 0 : index
    %133 = vector.load %arg6[%c0_125, %c0_126, %c0_127] : memref<2x8x256xf32, #tpu.memory_space<vmem>>, vector<1x8x256xf32>
    %134 = vector.shape_cast %133 : vector<1x8x256xf32> to vector<8x256xf32>
    %135 = vector.shape_cast %132 : vector<8x256xf32> to vector<1x8x256xf32>
    tpu.vector_store %arg6[%c0_125, %c0_126, %c0_127], %135 {strides = array<i32>} : memref<2x8x256xf32, #tpu.memory_space<vmem>>, vector<1x8x256xf32>,
    %136 = vector.extract_strided_slice %131 {offsets = [0, 256], sizes = [8, 256], strides = [1, 1]} : vector<8x512xf32> to vector<8x256xf32>
    %c1_128 = arith.constant 1 : index
    %c0_129 = arith.constant 0 : index
    %c0_130 = arith.constant 0 : index
    %137 = vector.load %arg6[%c1_128, %c0_129, %c0_130] : memref<2x8x256xf32, #tpu.memory_space<vmem>>, vector<1x8x256xf32>
    %138 = vector.shape_cast %137 : vector<1x8x256xf32> to vector<8x256xf32>
    %139 = vector.shape_cast %136 : vector<8x256xf32> to vector<1x8x256xf32>
    tpu.vector_store %arg6[%c1_128, %c0_129, %c0_130], %139 {strides = array<i32>} : memref<2x8x256xf32, #tpu.memory_space<vmem>>, vector<1x8x256xf32>,
    return
  }
  func.func @transform_0(%arg0: i32) -> (i32, i32, i32) {
    %c0_i32 = arith.constant 0 : i32
    %c0_i32_0 = arith.constant 0 : i32
    %c0_i32_1 = arith.constant 0 : i32
    %c0_i32_2 = arith.constant 0 : i32
    return %c0_i32, %c0_i32_0, %c0_i32_1 : i32, i32, i32
  }
  func.func @transform_1(%arg0: i32) -> (i32, i32) {
    %c0_i32 = arith.constant 0 : i32
    %c0_i32_0 = arith.constant 0 : i32
    %c0_i32_1 = arith.constant 0 : i32
    return %c0_i32, %c0_i32_0 : i32, i32
  }
  func.func @transform_2(%arg0: i32) -> (i32, i32, i32) {
    %c0_i32 = arith.constant 0 : i32
    %c0_i32_0 = arith.constant 0 : i32
    %c0_i32_1 = arith.constant 0 : i32
    %c0_i32_2 = arith.constant 0 : i32
    return %c0_i32, %c0_i32_0, %c0_i32_1 : i32, i32, i32
  }
  func.func @transform_3(%arg0: i32) -> (i32, i32) {
    %c0_i32 = arith.constant 0 : i32
    %c0_i32_0 = arith.constant 0 : i32
    %c0_i32_1 = arith.constant 0 : i32
    return %c0_i32, %c0_i32_0 : i32, i32
  }
  func.func @transform_4(%arg0: i32) -> (i32, i32) {
    %c0_i32 = arith.constant 0 : i32
    %c0_i32_0 = arith.constant 0 : i32
    %c0_i32_1 = arith.constant 0 : i32
    return %c0_i32, %c0_i32_0 : i32, i32
  }
  func.func @transform_5(%arg0: i32) -> (i32, i32, i32) {
    %c0_i32 = arith.constant 0 : i32
    %c0_i32_0 = arith.constant 0 : i32
    %c0_i32_1 = arith.constant 0 : i32
    %c0_i32_2 = arith.constant 0 : i32
    return %c0_i32, %c0_i32_0, %c0_i32_1 : i32, i32, i32
  }
}

</mosaic_0001>

<bundles_post_ra>
// kernel: conv_bn_relu.1
= control target key start
LH: loop header
LB: loop body
LE: loop exit
PB: predicated region body
PF: predicated region fallthrough
CT: control target
= control target key end

     0   :  { %v35_v0 = vlaneseq  ;;  %v1222_v1 = vmov 1966171168   ;;  %s1223_s22 = smov 34   ;;  %s1225_s23 = smov 18   ;;  %vm431_vm0 = vcmask 277504   ;;  %vm349_vm1 = vcmask 261120   ;;  %s1463_s2 = inlined_call_operand.vmem [shape: bf16[3,1,256], index: 2, kind: input, shape index: {}]   ;;  %s1464_s0 = inlined_call_operand.vmem [shape: bf16[2,8,290], index: 0, kind: input, shape index: {}]   ;;  %s1465_s1 = inlined_call_operand.vmem [shape: bf16[8,72], index: 1, kind: input, shape index: {}]   ;;  %s1466_s3 = inlined_call_operand.vmem [shape: f32[8,1], index: 3, kind: input, shape index: {}]   ;;  %s1467_s4 = inlined_call_operand.vmem [shape: f32[8,1], index: 4, kind: input, shape index: {}]   ;;  %s1468_s5 = inlined_call_operand.vmem [shape: f32[2,8,256], index: 5, kind: output, shape index: {}]  }
   0x1   :  { %v33_v2 = vunpack.c.l.s4 %v1222_v1  ;;  %v1143_v3 = vld.sshfl [vmem:[%s1463_s2 + $0x4] sm:$0x11 pattern:$0x75316420]  ;;  %s1226_s24 = smov 2   ;;  %s1227_s25 = smov 16  }
   0x2   :  { %v36_v4 = vshrl.u32 %v35_v0, 7  ;;  %v1140_v5 = vld.sshfl [vmem:[%s1463_s2] sm:$0x11 pattern:$0x75316420]  ;;  %v394_v7 = vcombine.high %v1143_v3, %v1143_v3  ;;  %s1224_s2 = smov 32  }
   0x3   :  { %v34_v6 = vunpack.c.0.s8 %v33_v2  ;;  %v312_v8 = vcombine.high %v1140_v5, %v1140_v5  ;;  %v369_v25 = vld [vmem:[%s1464_s0 + $0x8] sm:$0xf]  ;;  %v1285_v26 = vld [vmem:[%s1464_s0] sm:$0xff]  ;;  %s1228_s30 = smov 95   ;;  %s1229_s8 = smov 111   ;;  %v1298_v29 = vld [vmem:[%s1464_s0 + $0xc] sm:$0xff] }
   0x4   :  { %v51_v10 = vsub.s32 0, %v36_v4  ;;  %v220_v27 = vld [vmem:[%s1464_s0 + $0x8] sm:$0xf]  ;;  %v1171_v28 = vld [vmem:[%s1464_s0 + $0x14] sm:$0xf]  ;;  %s1230_s17 = smov 127  }
   0x5   :  { %v37_v9 = vsub.s32 %v34_v6, %v36_v4  ;;  %v1160_v30 = vld [vmem:[%s1464_s0 + $0x14] sm:$0xf]  ;;  %v69_v31 = vld [vmem:[%s1464_s0 + $0x8] sm:$0xf]  ;;  %vm282_vm2 = vcmask 146432   ;;  %s1233_s29 = smov 110  }
   0x6   :  { %v384_v33 = vld [vmem:[%s1464_s0 + $0x8] sm:$0xf]  ;;  %v1173_v43 = vld [vmem:[%s1464_s0 + $0x14] sm:$0xf]  ;;  %vm133_vm3 = vcmask 15360   ;;  %vm200_vm4 = vcmask 130048  }
   0x7   :  { %v401_v11 = vrot.slane %v1143_v3, %v37_v9  ;;  %v408_v12 = vrot.slane %v394_v7, %v37_v9  ;;  %v319_v13 = vrot.slane %v1140_v5, %v37_v9  ;;  %v326_v14 = vrot.slane %v312_v8, %v37_v9  ;;  %v302_v40 = vld [vmem:[%s1464_s0 + $0x8] sm:$0xf]  ;;  %v1167_v57 = vld [vmem:[%s1464_s0 + $0x14] sm:$0xf]  ;;  %s1234_s9 = smov 126   ;;  %s1235_s12 = smov 112  }
   0x8   :  { %v235_v51 = vld [vmem:[%s1464_s0 + $0x8] sm:$0xf]  ;;  %vm78_vm5 = vcmask 1043456   ;;  %vm446_vm6 = vcmask 769024   ;;  %vm379_vm7 = vcmask 777216   ;;  %vm364_vm8 = vcmask 785408  }
   0x9   :  { %v410_v15 = vpack.i.b16 %v401_v11, %v401_v11  ;;  %v417_v16 = vpack.i.b16 %v408_v12, %v408_v12  ;;  %v328_v17 = vpack.i.b16 %v319_v13, %v319_v13  ;;  %v335_v18 = vpack.i.b16 %v326_v14, %v326_v14  ;;  %v85_v63 = vld [vmem:[%s1464_s0 + $0x8] sm:$0xf]  ;;  %v1162_v11 = vld [vmem:[%s1464_s0 + $0x14] sm:$0xf] }
   0xa   :  { %v153_v5 = vld [vmem:[%s1464_s0 + $0x8] sm:$0xf]  ;;  %vm230_vm9 = vcmask 908288   ;;  %vm297_vm10 = vcmask 900096   ;;  %vm80_vm11 = vcmask 1039360   ;;  %vm148_vm12 = vcmask 1031168  }
   0xb   :  { %v415_v19 = vrot.slane %v410_v15, %v51_v10  ;;  %v422_v20 = vrot.slane %v417_v16, %v51_v10  ;;  %v333_v21 = vrot.slane %v328_v17, %v51_v10  ;;  %v340_v22 = vrot.slane %v335_v18, %v51_v10  ;;  %v1151_v17 = vld [vmem:[%s1464_s0 + $0x14] sm:$0xf] }
   0xc   :  { %vm215_vm13 = vcmask 916480   ;;  %vm974_vm14 = vcmask 588800  }
   0xd   :  { %v1144_v23 = vcombine.low %v415_v19, %v422_v20  ;;  %v1273_v24 = vcombine.low %v333_v21, %v340_v22  ;;  %v1236_v20 = vmov 0  }
   0xe   :  { %1023 = vmatprep.mubr.bf16.mxu0 %v1236_v20  ;;  %1064 = vmatprep.mubr.bf16.mxu1 %v1236_v20 }
   0xf   :  { %428 = vrot.lane.b32.xlu0 %v1144_v23, %s1223_s22  ;;  %845 = vrot.lane.b32.xlu1 %v1144_v23, %s1223_s22  ;;  %s1231_s22 = smov 94  }
  0x10   :  { %1218 = vset.pattern.permute.xlu0 %v1236_v20  ;;  %1219 = vset.pattern.permute.xlu1 %v1236_v20 }
  0x13   :  { %346 = vrot.lane.b32.xlu0 %v1273_v24, %s1224_s2  ;;  %279 = vrot.lane.b32.xlu1 %v1144_v23, %s1225_s23 }
  0x17   :  { %766 = vrot.lane.b32.xlu0 %v1273_v24, %s1224_s2  ;;  %130 = vrot.lane.b32.xlu1 %v1144_v23, %s1226_s24 }
  0x1b   :  { %197 = vrot.lane.b32.xlu0 %v1273_v24, %s1227_s25  ;;  %701 = vrot.lane.b32.xlu1 %v1144_v23, %s1225_s23 }
  0x1f   :  { %557 = vrot.lane.b32.xlu0 %v1144_v23, %s1226_s24  ;;  %622 = vrot.lane.b32.xlu1 %v1273_v24, %s1227_s25  ;;  %s1232_s24 = smov 96  }
  0x23   :  { %374 = vrot.lane.b32.xlu1 %v369_v25, %s1228_s30  ;;  %372 = vrot.lane.b32.xlu0 %v1285_v26, %s1228_s30  ;;  %v1156_v25 = vld [vmem:[%s1464_s0 + $0x14] sm:$0xf] }
  0x27   :  { %225 = vrot.lane.b32.xlu1 %v220_v27, %s1229_s8  ;;  %223 = vrot.lane.b32.xlu0 %v1285_v26, %s1229_s8 }
  0x2b   :  { %792 = vrot.lane.b32.xlu1 %v1171_v28, %s1228_s30  ;;  %790 = vrot.lane.b32.xlu0 %v1298_v29, %s1228_s30 }
  0x2f   :  { %648 = vrot.lane.b32.xlu1 %v1160_v30, %s1229_s8  ;;  %646 = vrot.lane.b32.xlu0 %v1298_v29, %s1229_s8 }
  0x33   :  { %74 = vrot.lane.b32.xlu1 %v69_v31, %s1230_s17  ;;  %72 = vrot.lane.b32.xlu0 %v1285_v26, %s1230_s17 }
  0x81   :  { %v429_v32 = vpop.permute.xlu0 %428  ;;  %v846_v34 = vpop.permute.xlu1 %845 }
  0x82   :  { %v430_v35 = vrot.slane %v429_v32, 4  ;;  %v847_v42 = vrot.slane %v846_v34, 4 }
  0x84   :  { %v432_v36 = vsel %vm431_vm0, %v430_v35, %v429_v32  ;;  %v436_v37 = vmul.bf16 %v430_v35, %v384_v33  ;;  %v848_v48 = vsel %vm431_vm0, %v847_v42, %v846_v34  ;;  %v852_v49 = vmul.bf16 %v1173_v43, %v847_v42  ;;  %v1149_v32 = vld [vmem:[%s1464_s0 + $0x14] sm:$0xf] }
  0x85   :  { %v435_v38 = vmul.bf16 %v432_v36, %v1285_v26  ;;  %v347_v39 = vpop.permute.xlu0 %346  ;;  %v280_v44 = vpop.permute.xlu1 %279  ;;  %v851_v53 = vmul.bf16 %v1298_v29, %v848_v48 }
  0x86   :  { %v348_v41 = vrot.slane %v347_v39, 4  ;;  %441 = vrot.lane.b32.xlu1 %v436_v37, %s1231_s22  ;;  %v281_v50 = vrot.slane %v280_v44, 4 }
  0x87   :  { %439 = vrot.lane.b32.xlu0 %v435_v38, %s1231_s22 }
  0x88   :  { %v350_v45 = vsel %vm349_vm1, %v348_v41, %v347_v39  ;;  %v354_v46 = vmul.bf16 %v348_v41, %v302_v40  ;;  %v283_v54 = vsel %vm282_vm2, %v281_v50, %v280_v44  ;;  %v287_v55 = vmul.bf16 %v281_v50, %v235_v51 }
  0x89   :  { %v353_v47 = vmul.bf16 %v1285_v26, %v350_v45  ;;  %v767_v52 = vpop.permute.xlu0 %766  ;;  %v131_v58 = vpop.permute.xlu1 %130  ;;  %v286_v59 = vmul.bf16 %v1285_v26, %v283_v54 }
  0x8a   :  { %359 = vrot.lane.b32.xlu1 %v354_v46, %s1232_s24  ;;  %v768_v56 = vrot.slane %v767_v52, 4  ;;  %v132_v62 = vrot.slane %v131_v58, 4 }
  0x8b   :  { %357 = vrot.lane.b32.xlu0 %v353_v47, %s1232_s24 }
  0x8c   :  { %v769_v60 = vsel %vm349_vm1, %v768_v56, %v767_v52  ;;  %v773_v61 = vmul.bf16 %v1167_v57, %v768_v56  ;;  %v134_v2 = vsel %vm133_vm3, %v132_v62, %v131_v58  ;;  %v138_v3 = vmul.bf16 %v132_v62, %v85_v63 }
  0x8d   :  { %v198_v0 = vpop.permute.xlu0 %197  ;;  %v772_v1 = vmul.bf16 %v1298_v29, %v769_v60  ;;  %v702_v6 = vpop.permute.xlu1 %701  ;;  %v137_v7 = vmul.bf16 %v1285_v26, %v134_v2 }
  0x8e   :  { %857 = vrot.lane.b32.xlu1 %v852_v49, %s1231_s22  ;;  %v199_v4 = vrot.slane %v198_v0, 4  ;;  %v703_v10 = vrot.slane %v702_v6, 4 }
  0x8f   :  { %855 = vrot.lane.b32.xlu0 %v851_v53, %s1231_s22 }
  0x90   :  { %v201_v8 = vsel %vm200_vm4, %v199_v4, %v198_v0  ;;  %v205_v9 = vmul.bf16 %v199_v4, %v153_v5  ;;  %v704_v14 = vsel %vm282_vm2, %v703_v10, %v702_v6  ;;  %v708_v15 = vmul.bf16 %v1162_v11, %v703_v10 }
  0x91   :  { %v558_v12 = vpop.permute.xlu0 %557  ;;  %v204_v13 = vmul.bf16 %v1285_v26, %v201_v8  ;;  %v623_v18 = vpop.permute.xlu1 %622  ;;  %v707_v19 = vmul.bf16 %v1298_v29, %v704_v14 }
  0x92   :  { %292 = vrot.lane.b32.xlu1 %v287_v55, %s1233_s29  ;;  %v559_v16 = vrot.slane %v558_v12, 4  ;;  %v624_v23 = vrot.slane %v623_v18, 4 }
  0x93   :  { %290 = vrot.lane.b32.xlu0 %v286_v59, %s1233_s29 }
  0x94   :  { %v560_v21 = vsel %vm133_vm3, %v559_v16, %v558_v12  ;;  %v564_v22 = vmul.bf16 %v1151_v17, %v559_v16  ;;  %v625_v28 = vsel %vm200_vm4, %v624_v23, %v623_v18  ;;  %v629_v30 = vmul.bf16 %v1156_v25, %v624_v23 }
  0x95   :  { %v563_v27 = vmul.bf16 %v1298_v29, %v560_v21  ;;  %v628_v31 = vmul.bf16 %v1298_v29, %v625_v28  ;;  %v375_v33 = vpop.permute.xlu1 %374  ;;  %v373_v34 = vpop.permute.xlu0 %372 }
  0x96   :  { %778 = vrot.lane.b32.xlu1 %v773_v61, %s1232_s24  ;;  %v377_v44 = vrot.slane %v375_v33, 4  ;;  %v376_v45 = vrot.slane %v373_v34, 4 }
  0x97   :  { %776 = vrot.lane.b32.xlu0 %v772_v1, %s1232_s24 }
  0x98   :  { %v378_v51 = vsel %vm78_vm5, %v376_v45, %v377_v44 }
  0x99   :  { %v226_v35 = vpop.permute.xlu1 %225  ;;  %v224_v36 = vpop.permute.xlu0 %223  ;;  %v380_v58 = vsel %vm379_vm7, %v373_v34, %v378_v51 }
  0x9a   :  { %143 = vrot.lane.b32.xlu1 %v138_v3, %s1234_s9  ;;  %v228_v62 = vrot.slane %v226_v35, 4  ;;  %v227_v63 = vrot.slane %v224_v36, 4 }
  0x9b   :  { %141 = vrot.lane.b32.xlu0 %v137_v7, %s1234_s9 }
  0x9c   :  { %v229_v8 = vsel %vm78_vm5, %v227_v63, %v228_v62 }
  0x9d   :  { %v1379_v37 = vpop.permute.xlu1 %792  ;;  %v1381_v38 = vpop.permute.xlu0 %790  ;;  %v231_v20 = vsel %vm230_vm9, %v224_v36, %v229_v8 }
  0x9e   :  { %210 = vrot.lane.b32.xlu1 %v205_v9, %s1235_s12  ;;  %v795_v9 = vrot.slane %v1379_v37, 4 }
  0x9f   :  { %208 = vrot.lane.b32.xlu0 %v204_v13, %s1235_s12  ;;  %v794_v13 = vrot.slane %v1381_v38, 4 }
  0xa1   :  { %v1383_v39 = vpop.permute.xlu1 %648  ;;  %v1385_v40 = vpop.permute.xlu0 %646  ;;  %v796_v25 = vsel %vm78_vm5, %v794_v13, %v795_v9 }
  0xa2   :  { %713 = vrot.lane.b32.xlu1 %v708_v15, %s1233_s29  ;;  %v797_v33 = vsel %vm379_vm7, %v1381_v38, %v796_v25 }
  0xa3   :  { %711 = vrot.lane.b32.xlu0 %v707_v19, %s1233_s29 }
  0xa5   :  { %v1387_v41 = vpop.permute.xlu1 %74  ;;  %v1389_v42 = vpop.permute.xlu0 %72 }
  0xa6   :  { %569 = vrot.lane.b32.xlu1 %v564_v22, %s1234_s9  ;;  %v77_v34 = vrot.slane %v1387_v41, 4  ;;  %v76_v35 = vrot.slane %v1389_v42, 4  ;;  %v650_v41 = vrot.slane %v1385_v40, 4 }
  0xa7   :  { %567 = vrot.lane.b32.xlu0 %v563_v27, %s1234_s9 }
  0xaa   :  { %634 = vrot.lane.b32.xlu1 %v629_v30, %s1235_s12 }
  0xab   :  { %632 = vrot.lane.b32.xlu0 %v628_v31, %s1235_s12 }
  0xae   :  { %504 = vrot.lane.b32.xlu1 %v1149_v32, %s1230_s17 }
  0xaf   :  { %502 = vrot.lane.b32.xlu0 %v1298_v29, %s1230_s17 }
  0xf8   :  { %v442_v43 = vpop.permute.xlu1 %441 }
  0xf9   :  { %v444_v46 = vrot.slane %v442_v43, 4  ;;  %v440_v47 = vpop.permute.xlu0 %439 }
  0xfa   :  { %v443_v48 = vrot.slane %v440_v47, 4 }
  0xfc   :  { %v445_v49 = vsel %vm78_vm5, %v443_v48, %v444_v46  ;;  %v360_v50 = vpop.permute.xlu1 %359  ;;  %v651_v48 = vrot.slane %v1383_v39, 4 }
  0xfd   :  { %v447_v52 = vsel %vm446_vm6, %v440_v47, %v445_v49  ;;  %v362_v53 = vrot.slane %v360_v50, 4  ;;  %v358_v54 = vpop.permute.xlu0 %357  ;;  %v79_v50 = vsel %vm78_vm5, %v76_v35, %v77_v34 }
  0xfe   :  { %v361_v55 = vrot.slane %v358_v54, 4  ;;  %v1194_v56 = vcombine.high %v447_v52, %v447_v52  ;;  %v1193_v57 = vcombine.low %v447_v52, %v447_v52  ;;  %v81_v39 = vsel %vm80_vm11, %v1389_v42, %v79_v50 }
 0x100   :  { %v363_v59 = vsel %vm78_vm5, %v361_v55, %v362_v53  ;;  %v858_v60 = vpop.permute.xlu1 %857  ;;  %1197 = vmatprep.subr.msk.bf16.mxu0 %vm78_vm5, %v1194_v56  ;;  %v980_v61 = vsel %vm78_vm5, %v1193_v57, 0  ;;  %v66_v53 = vmul.bf16 %v1273_v24, %v1285_v26 }
 0x101   :  { %v365_v0 = vsel %vm364_vm8, %v358_v54, %v363_v59  ;;  %v860_v1 = vrot.slane %v858_v60, 4  ;;  %998 = vmatpush1.bf16.msra.mxu0 %v980_v61  ;;  %v856_v2 = vpop.permute.xlu0 %855  ;;  %v652_v60 = vsel %vm78_vm5, %v650_v41, %v651_v48 }
 0x102   :  { %v1189_v3 = vcombine.low %v365_v0, %v380_v58  ;;  %v1190_v4 = vcombine.high %v365_v0, %v380_v58  ;;  %v859_v5 = vrot.slane %v856_v2, 4  ;;  %v1178_v0 = vcombine.high %v66_v53, %v81_v39 }
 0x103   :  { %v1177_v8 = vcombine.low %v66_v53, %v81_v39 }
 0x104   :  { %v861_v6 = vsel %vm78_vm5, %v859_v5, %v860_v1  ;;  %v293_v7 = vpop.permute.xlu1 %292  ;;  %999 = vmatprep.subr.bf16.mxu0 %v1190_v4 }
 0x105   :  { %v862_v10 = vsel %vm446_vm6, %v856_v2, %v861_v6  ;;  %v295_v11 = vrot.slane %v293_v7, 4  ;;  %1000 = vmatpush1.bf16.msra.mxu0 %v1189_v3  ;;  %v291_v12 = vpop.permute.xlu0 %290  ;;  %v653_v2 = vsel %vm230_vm9, %v1385_v40, %v652_v60  ;;  %v865_v40 = vld [vmem:[%s1465_s1] sm:$0xf] }
 0x106   :  { %v294_v14 = vrot.slane %v291_v12, 4  ;;  %v1196_v15 = vcombine.high %v862_v10, %v862_v10  ;;  %v1195_v16 = vcombine.low %v862_v10, %v862_v10  ;;  %v1096_v60 = vld [vmem:[%s1467_s4] sm:$0xff] }
 0x108   :  { %v296_v17 = vsel %vm78_vm5, %v294_v14, %v295_v11  ;;  %v779_v18 = vpop.permute.xlu1 %778  ;;  %1199 = vmatprep.subr.msk.bf16.mxu1 %vm78_vm5, %v1196_v15  ;;  %v986_v19 = vsel %vm78_vm5, %v1195_v16, 0 }
 0x109   :  { %v298_v21 = vsel %vm297_vm10, %v291_v12, %v296_v17  ;;  %v781_v22 = vrot.slane %v779_v18, 4  ;;  %1039 = vmatpush1.bf16.msra.mxu1 %v986_v19  ;;  %v777_v23 = vpop.permute.xlu0 %776 }
 0x10a   :  { %v1185_v27 = vcombine.low %v231_v20, %v298_v21  ;;  %v1186_v28 = vcombine.high %v231_v20, %v298_v21  ;;  %v780_v30 = vrot.slane %v777_v23, 4 }
 0x10c   :  { %v782_v31 = vsel %vm78_vm5, %v780_v30, %v781_v22  ;;  %v144_v32 = vpop.permute.xlu1 %143  ;;  %1001 = vmatprep.subr.bf16.mxu0 %v1186_v28  ;;  %v496_v22 = vmul.bf16 %v1298_v29, %v1273_v24 }
 0x10d   :  { %v783_v36 = vsel %vm364_vm8, %v777_v23, %v782_v31  ;;  %1002 = vmatpush1.bf16.msra.mxu0 %v1185_v27  ;;  %v142_v37 = vpop.permute.xlu0 %141  ;;  %v146_v45 = vrot.slane %v144_v32, 4 }
 0x10e   :  { %v1191_v43 = vcombine.low %v783_v36, %v797_v33  ;;  %v1192_v44 = vcombine.high %v783_v36, %v797_v33  ;;  %v145_v46 = vrot.slane %v142_v37, 4 }
 0x110   :  { %v211_v47 = vpop.permute.xlu1 %210  ;;  %1040 = vmatprep.subr.bf16.mxu1 %v1192_v44  ;;  %v147_v51 = vsel %vm78_vm5, %v145_v46, %v146_v45 }
 0x111   :  { %v213_v49 = vrot.slane %v211_v47, 4  ;;  %1041 = vmatpush1.bf16.msra.mxu1 %v1191_v43  ;;  %v209_v38 = vpop.permute.xlu0 %208  ;;  %v149_v56 = vsel %vm148_vm12, %v142_v37, %v147_v51 }
 0x112   :  { %v212_v52 = vrot.slane %v209_v38, 4 }
 0x114   :  { %v214_v54 = vsel %vm78_vm5, %v212_v52, %v213_v49  ;;  %v714_v55 = vpop.permute.xlu1 %713 }
 0x115   :  { %v216_v57 = vsel %vm215_vm13, %v209_v38, %v214_v54  ;;  %v716_v58 = vrot.slane %v714_v55, 4  ;;  %v712_v59 = vpop.permute.xlu0 %711 }
 0x116   :  { %v1181_v61 = vcombine.low %v149_v56, %v216_v57  ;;  %v1182_v62 = vcombine.high %v149_v56, %v216_v57  ;;  %v715_v63 = vrot.slane %v712_v59, 4  ;;  %v1092_v57 = vld [vmem:[%s1466_s3] sm:$0xff] }
 0x118   :  { %v717_v26 = vsel %vm78_vm5, %v715_v63, %v716_v58  ;;  %v570_v1 = vpop.permute.xlu1 %569  ;;  %1003 = vmatprep.subr.bf16.mxu0 %v1182_v62 }
 0x119   :  { %v718_v42 = vsel %vm297_vm10, %v712_v59, %v717_v26  ;;  %1004 = vmatpush1.bf16.msra.mxu0 %v1181_v61  ;;  %v568_v3 = vpop.permute.xlu0 %567  ;;  %v572_v6 = vrot.slane %v570_v1, 4 }
 0x11a   :  { %v1187_v4 = vcombine.low %v653_v2, %v718_v42  ;;  %v1188_v5 = vcombine.high %v653_v2, %v718_v42  ;;  %v571_v7 = vrot.slane %v568_v3, 4  ;;  %1005 = vmatprep.subr.bf16.mxu0 %v1178_v0 }
 0x11c   :  { %v635_v9 = vpop.permute.xlu1 %634  ;;  %1042 = vmatprep.subr.bf16.mxu1 %v1188_v5  ;;  %v573_v12 = vsel %vm78_vm5, %v571_v7, %v572_v6 }
 0x11d   :  { %v637_v10 = vrot.slane %v635_v9, 4  ;;  %1043 = vmatpush1.bf16.msra.mxu1 %v1187_v4  ;;  %v633_v11 = vpop.permute.xlu0 %632  ;;  %1006 = vmatpush1.bf16.msra.mxu0 %v1177_v8  ;;  %v574_v16 = vsel %vm148_vm12, %v568_v3, %v573_v12 }
 0x11e   :  { %v636_v13 = vrot.slane %v633_v11, 4 }
 0x120   :  { %v638_v14 = vsel %vm78_vm5, %v636_v13, %v637_v10  ;;  %v505_v15 = vpop.permute.xlu1 %504  ;;  %1198 = vmatmul.mubr.msk.bf16.vlgmr.msra.gmra.mxu0 %vm974_vm14, %v865_v40 }
 0x121   :  { %v639_v17 = vsel %vm215_vm13, %v633_v11, %v638_v14  ;;  %v507_v18 = vrot.slane %v505_v15, 4  ;;  %v503_v19 = vpop.permute.xlu0 %502 }
 0x122   :  { %v1183_v20 = vcombine.low %v574_v16, %v639_v17  ;;  %v1184_v21 = vcombine.high %v574_v16, %v639_v17  ;;  %v506_v23 = vrot.slane %v503_v19, 4 }
 0x124   :  { %v508_v25 = vsel %vm78_vm5, %v506_v23, %v507_v18  ;;  %1044 = vmatprep.subr.bf16.mxu1 %v1184_v21 }
 0x125   :  { %v509_v27 = vsel %vm80_vm11, %v503_v19, %v508_v25  ;;  %1045 = vmatpush1.bf16.msra.mxu1 %v1183_v20 }
 0x126   :  { %v1179_v28 = vcombine.low %v496_v22, %v509_v27  ;;  %v1180_v30 = vcombine.high %v496_v22, %v509_v27 }
 0x128   :  { %1046 = vmatprep.subr.bf16.mxu1 %v1180_v30 }
 0x129   :  { %1047 = vmatpush1.bf16.msra.mxu1 %v1179_v28 }
 0x12c   :  { %1200 = vmatmul.mubr.msk.bf16.vlgmr.msra.gmra.mxu1 %vm974_vm14, %v865_v40 }
 0x1e0   :  { %v1025_v31 = vpop.f32.mrf.mxu0 }
 0x1e1   :  { %v1079_v35 = vmul.f32 %v1025_v31, %v1025_v31 }
 0x1e2   :  { %v1027_v32 = vpop.f32.mrf.mxu0 }
 0x1e3   :  { %v1080_v36 = vmul.f32 %v1027_v32, %v1027_v32  ;;  %v1073_v24 = vadd.f32 %v1027_v32, %v1025_v31 }
 0x1e4   :  { %v1029_v33 = vpop.f32.mrf.mxu0 }
 0x1e5   :  { %v1083_v44 = vadd.f32 %v1080_v36, %v1079_v35 }
 0x1e6   :  { %v1030_v34 = vpop.f32.mrf.mxu0 }
 0x1ec   :  { %v1066_v29 = vpop.f32.mrf.mxu1 }
 0x1ed   :  { %v1081_v37 = vmul.f32 %v1066_v29, %v1066_v29  ;;  %v1074_v43 = vadd.f32 %v1073_v24, %v1066_v29 }
 0x1ee   :  { %v1068_v45 = vpop.f32.mrf.mxu1 }
 0x1ef   :  { %v1075_v46 = vadd.f32 %v1074_v43, %v1068_v45  ;;  %v1082_v47 = vmul.f32 %v1068_v45, %v1068_v45  ;;  %v1084_v48 = vadd.f32 %v1083_v44, %v1081_v37 }
 0x1f0   :  { %v1070_v49 = vpop.f32.mrf.mxu1 }
 0x1f1   :  { %1076 = vadd.xlane.f32.xlu0 %v1075_v46  ;;  %v1085_v38 = vadd.f32 %v1084_v48, %v1082_v47 }
 0x1f2   :  { %v1071_v41 = vpop.f32.mrf.mxu1 }
 0x1f3   :  { %1086 = vadd.xlane.f32.xlu1 %v1085_v38 }
 0x27a   :  { %v1077_v50 = vpop.xlane.xlu0 %1076 }
 0x27b   :  { %v1078_v51 = vmul.f32 0.001953125, %v1077_v50 }
 0x27c   :  { %v1087_v52 = vpop.xlane.xlu1 %1086 }
 0x27d   :  { %v1089_v53 = vmul.f32 %v1078_v51, %v1078_v51  ;;  %v1088_v54 = vmul.f32 0.001953125, %v1087_v52 }
 0x27f   :  { %v1090_v55 = vsub.f32 %v1088_v54, %v1089_v53 }
 0x281   :  { %v1091_v39 = vmax.f32 %v1090_v55, 0.0 }
 0x283   :  { %v1093_v56 = vadd.f32 1e-05, %v1091_v39 }
 0x285   :  { %1220 = vrsqrt.f32 %v1093_v56 }
 0x292   :  { %v1221_v58 = vpop.eup %1220 }
 0x293   :  { %v1095_v59 = vmul.f32 %v1221_v58, %v1092_v57 }
 0x295   :  { %1101 = vperm.xlu0 %1218, %v1095_v59   ;;  %v1097_v61 = vmul.f32 %v1095_v59, %v1078_v51 }
 0x297   :  { %v1098_v62 = vsub.f32 %v1096_v60, %v1097_v61 }
 0x299   :  { %1110 = vperm.xlu1 %1219, %v1098_v62  }
 0x310   :  { %v1102_v63 = vpop.permute.xlu0 %1101 }
 0x311   :  { %v1104_v0 = vmul.f32 %v1102_v63, %v1025_v31  ;;  %v1105_v26 = vmul.f32 %v1102_v63, %v1027_v32  ;;  %v1106_v1 = vmul.f32 %v1102_v63, %v1066_v29  ;;  %v1107_v2 = vmul.f32 %v1102_v63, %v1068_v45 }
 0x314   :  { %v1111_v42 = vpop.permute.xlu1 %1110 }
 0x315   :  { %v1113_v3 = vadd.f32 %v1111_v42, %v1104_v0  ;;  %v1114_v4 = vadd.f32 %v1111_v42, %v1105_v26  ;;  %v1115_v5 = vadd.f32 %v1111_v42, %v1106_v1  ;;  %v1116_v6 = vadd.f32 %v1111_v42, %v1107_v2 }
 0x317   :  { %v1117_v7 = vmax.f32 %v1113_v3, 0.0  ;;  %v1118_v8 = vmax.f32 %v1114_v4, 0.0  ;;  %v1119_v9 = vmax.f32 %v1115_v5, 0.0  ;;  %v1120_v10 = vmax.f32 %v1116_v6, 0.0 }
 0x319   :  { %1121 = vst [vmem:[%s1468_s5] sm:$0xff] %v1117_v7  ;;  %1122 = vst [vmem:[%s1468_s5 + $0x8] sm:$0xff] %v1118_v8 }
 0x31a   :  { %1201 = vst [vmem:[%s1468_s5 + $0x10] sm:$0xff] %v1119_v9  ;;  %1202 = vst [vmem:[%s1468_s5 + $0x18] sm:$0xff] %v1120_v10 }

</bundles_post_ra>
